<compile_context>
chip_gen: v5e
topology: v5e:2x2
jax: 0.10.0
libtpu: 0.0.40
codegen_flags: <defaults>
</compile_context>

<pallas_src>
import functools

import jax
import jax.numpy as jnp
import numpy as np
from jax import lax
from jax.experimental import pallas as pl
from jax.experimental.pallas import tpu as pltpu


# ----------------------------------------------------------------------------
# helpers
# ----------------------------------------------------------------------------

def _pick_tile(dim, candidates):
    """Largest candidate tile that divides `dim`; otherwise the full dim.

    Keeps the (8, 128) block constraint satisfied: every candidate is a multiple
    of 128, and the full-dim fallback is always legal.
    """
    for c in candidates:
        if dim % c == 0:
            return c
    return dim


# ----------------------------------------------------------------------------
# fused QKV projection + rotary embedding kernel (q is pre-scaled by 1/sqrt(D))
# ----------------------------------------------------------------------------

def _qkv_rope_kernel(x_ref, w_ref, cos_ref, sin_ref, q_ref, k_ref, v_ref, *,
                     E, scale):
    x = x_ref[...]                                   # (ts, E)    activation dtype
    w = w_ref[...]                                   # (3E, E)    weight dtype
    # y = x @ W^T in NT form (contract dim 1 of both) -> no XLU transpose of W.
    qkv = lax.dot_general(x, w, (((1,), (1,)), ((), ())),
                          preferred_element_type=jnp.float32)      # (ts, 3E) f32
    q = qkv[:, :E]
    k = qkv[:, E:2 * E]
    v = qkv[:, 2 * E:]

    cos = cos_ref[...]                               # (ts, E) f32, per-head expanded
    sin = sin_ref[...]                               # (ts, E) f32, signs folded (-s,+s,...)

    lane = lax.broadcasted_iota(jnp.int32, (q.shape[0], E), 1)
    even = (lane & 1) == 0

    def rope(t):
        # Even/odd pair swap done fully in-kernel (no HBM round trip):
        #   swapped[2i] = t[2i+1], swapped[2i+1] = t[2i]
        nxt = jnp.roll(t, -1, axis=1)                # t[i+1] at position i
        prv = jnp.roll(t, 1, axis=1)                 # t[i-1] at position i
        swapped = jnp.where(even, nxt, prv)
        # complex rotation: out = t * cos + swap(t) * (signed sin)
        return t * cos + swapped * sin

    # Fold the attention scale into q here (cheap (ts,E) mul) so the attention
    # inner loop never scales the (tq,tkv) score tiles.
    q_ref[...] = (rope(q) * scale).astype(q_ref.dtype)
    k_ref[...] = rope(k).astype(k_ref.dtype)
    v_ref[...] = v.astype(v_ref.dtype)


def qkv_rope_proj(x, w_qkv, cos_e, sin_e, scale):
    """x: [B,S,E], w_qkv: [3E,E], cos_e/sin_e: [S,E] -> (q*scale, k, v), each [B,S,E]."""
    B, S, E = x.shape
    ts = _pick_tile(S, (256, 128))
    grid = (B, S // ts)

    io_spec = pl.BlockSpec((pl.Squeezed(), ts, E), lambda b, s: (b, s, 0))
    w_spec = pl.BlockSpec((3 * E, E), lambda b, s: (0, 0))
    r_spec = pl.BlockSpec((ts, E), lambda b, s: (s, 0))

    itemsize = jnp.dtype(x.dtype).itemsize
    cost = pl.CostEstimate(
        flops=2 * B * S * (3 * E) * E,
        transcendentals=0,
        bytes_accessed=int((4 * B * S * E + 3 * E * E) * itemsize + 2 * S * E * 4),
    )

    out_shape = tuple(jax.ShapeDtypeStruct((B, S, E), x.dtype) for _ in range(3))
    q, k, v = pl.pallas_call(
        functools.partial(_qkv_rope_kernel, E=E, scale=scale),
        out_shape=out_shape,
        grid=grid,
        in_specs=[io_spec, w_spec, r_spec, r_spec],
        out_specs=(io_spec, io_spec, io_spec),
        compiler_params=pltpu.CompilerParams(
            dimension_semantics=("parallel", "parallel"),
            vmem_limit_bytes=32 * 1024 * 1024),
        cost_estimate=cost,
    )(x, w_qkv, cos_e, sin_e)
    return q, k, v


# ----------------------------------------------------------------------------
# flash attention kernel (online softmax over a kv grid axis)
# optionally fused with the output projection at the finalize step
# ----------------------------------------------------------------------------

def _flash_attn_kernel(*refs, H, D, has_mask, fuse_wo):
    idx = 0
    q_ref, k_ref, v_ref = refs[idx], refs[idx + 1], refs[idx + 2]
    idx += 3
    mask_ref = None
    if has_mask:
        mask_ref = refs[idx]
        idx += 1
    wo_ref = None
    if fuse_wo:
        wo_ref = refs[idx]
        idx += 1
    o_ref, m_sc, l_sc, acc_sc = refs[idx], refs[idx + 1], refs[idx + 2], refs[idx + 3]

    kv_step = pl.program_id(2)

    @pl.when(kv_step == 0)
    def _():
        m_sc[...] = jnp.full(m_sc.shape, -jnp.inf, dtype=m_sc.dtype)
        l_sc[...] = jnp.zeros(l_sc.shape, dtype=l_sc.dtype)
        acc_sc[...] = jnp.zeros(acc_sc.shape, dtype=acc_sc.dtype)

    q = q_ref[...]                                   # (tq,  E)  activation dtype (pre-scaled)
    k = k_ref[...]                                   # (tkv, E)
    v = v_ref[...]                                   # (tkv, E)

    if has_mask:
        mask = mask_ref[...].astype(jnp.float32)     # (Hm, tq, tkv)
        hm = mask_ref.shape[0]

    # Heads are folded into the lane-dense E slab; unroll over H (small, static).
    for h in range(H):
        q_h = q[:, h * D:(h + 1) * D]                # (tq, D)
        k_h = k[:, h * D:(h + 1) * D]                # (tkv, D)
        v_h = v[:, h * D:(h + 1) * D]                # (tkv, D)

        # NT-form q . k^T on the MXU (contract D of both operands, no transpose).
        s_h = lax.dot_general(q_h, k_h, (((1,), (1,)), ((), ())),
                              preferred_element_type=jnp.float32)          # (tq, tkv)
        if has_mask:
            s_h = s_h + (mask[0] if hm == 1 else mask[h])

        m_prev = m_sc[h]                                                    # (tq, 1)
        m_new = jnp.maximum(m_prev, jnp.max(s_h, axis=-1, keepdims=True))
        alpha = jnp.exp(m_prev - m_new)
        p_h = jnp.exp(s_h - m_new)                                          # (tq, tkv) f32

        l_sc[h] = alpha * l_sc[h] + jnp.sum(p_h, axis=-1, keepdims=True)
        acc_sc[h] = alpha * acc_sc[h] + jnp.dot(
            p_h.astype(v_h.dtype), v_h, preferred_element_type=jnp.float32)
        m_sc[h] = m_new

    @pl.when(kv_step == pl.num_programs(2) - 1)
    def _():
        outs = []
        for h in range(H):
            l_h = l_sc[h]
            inv = pl.reciprocal(l_h, approx=True)    # EUP slot
            inv = inv * (2.0 - l_h * inv)            # Newton refine -> f32 accuracy
            inv = inv * (2.0 - l_h * inv)
            outs.append(acc_sc[h] * inv)             # (tq, D)
        # Lane-dense (tq, E) slab — no masked partial stores.
        ctx = jnp.concatenate(outs, axis=-1)
        if fuse_wo:
            # Fused output projection: ctx @ wo^T in NT form, f32 accumulation.
            ctx = ctx.astype(wo_ref.dtype)
            out = lax.dot_general(ctx, wo_ref[...], (((1,), (1,)), ((), ())),
                                  preferred_element_type=jnp.float32)
            o_ref[...] = out.astype(o_ref.dtype)
        else:
            o_ref[...] = ctx.astype(o_ref.dtype)


def flash_attention(q, k, v, attention_mask, wo, *, H):
    """q,k,v: [B,S,E] (E = H*D, q pre-scaled); optional additive mask
    [B, 1 or H, S, S]; wo: [E,E] (fused out-proj) or None -> output [B,S,E]."""
    B, S, E = q.shape
    D = E // H
    tq = _pick_tile(S, (256, 128))
    tkv = _pick_tile(S, (512, 256, 128))
    grid = (B, S // tq, S // tkv)

    qo_spec = pl.BlockSpec((pl.Squeezed(), tq, E), lambda b, i, j: (b, i, 0))
    kv_spec = pl.BlockSpec((pl.Squeezed(), tkv, E), lambda b, i, j: (b, j, 0))

    in_specs = [qo_spec, kv_spec, kv_spec]
    args = [q, k, v]

    has_mask = attention_mask is not None
    if has_mask:
        Hm = attention_mask.shape[1]
        in_specs.append(pl.BlockSpec((pl.Squeezed(), Hm, tq, tkv),
                                     lambda b, i, j: (b, 0, i, j)))
        args.append(attention_mask)

    fuse_wo = wo is not None
    if fuse_wo:
        in_specs.append(pl.BlockSpec((E, E), lambda b, i, j: (0, 0)))
        args.append(wo)

    itemsize = jnp.dtype(q.dtype).itemsize
    proj_flops = 2 * B * S * E * E if fuse_wo else 0
    cost = pl.CostEstimate(
        flops=4 * B * H * S * S * D + proj_flops,
        transcendentals=B * H * S * S,
        bytes_accessed=int((4 * B * S * E + (E * E if fuse_wo else 0)) * itemsize),
    )

    kernel = functools.partial(_flash_attn_kernel, H=H, D=D,
                               has_mask=has_mask, fuse_wo=fuse_wo)
    return pl.pallas_call(
        kernel,
        out_shape=jax.ShapeDtypeStruct((B, S, E), q.dtype),
        grid=grid,
        in_specs=in_specs,
        out_specs=qo_spec,
        scratch_shapes=[
            pltpu.VMEM((H, tq, 1), jnp.float32),     # running max  m
            pltpu.VMEM((H, tq, 1), jnp.float32),     # running sum  l
            pltpu.VMEM((H, tq, D), jnp.float32),     # running output accumulator
        ],
        compiler_params=pltpu.CompilerParams(
            dimension_semantics=("parallel", "parallel", "arbitrary"),
            vmem_limit_bytes=32 * 1024 * 1024),
        cost_estimate=cost,
    )(*args)


# ----------------------------------------------------------------------------
# tiled output projection (NT-form linear) — fallback when E is too big to fuse
# ----------------------------------------------------------------------------

def _linear_nt_kernel(x_ref, w_ref, o_ref):
    # y = x @ W^T via NT-form dot_general (no in-kernel transpose of W).
    o_ref[...] = lax.dot_general(
        x_ref[...], w_ref[...], (((1,), (1,)), ((), ())),
        preferred_element_type=jnp.float32).astype(o_ref.dtype)


def linear_nt(x2d, w):
    """x2d: [M, K], w (nn.Linear layout): [N, K] -> [M, N]."""
    M, K = x2d.shape
    N = w.shape[0]
    tm = _pick_tile(M, (512, 256, 128))
    tn = _pick_tile(N, (256, 128))
    # TODO(synk): add a K grid axis + f32 VMEM accumulator for very large in_features.
    itemsize = jnp.dtype(x2d.dtype).itemsize
    cost = pl.CostEstimate(flops=2 * M * N * K, transcendentals=0,
                           bytes_accessed=int((M * K + N * K + M * N) * itemsize))
    return pl.pallas_call(
        _linear_nt_kernel,
        out_shape=jax.ShapeDtypeStruct((M, N), x2d.dtype),
        grid=(M // tm, N // tn),
        in_specs=[pl.BlockSpec((tm, K), lambda i, j: (i, 0)),
                  pl.BlockSpec((tn, K), lambda i, j: (j, 0))],
        out_specs=pl.BlockSpec((tm, tn), lambda i, j: (i, j)),
        compiler_params=pltpu.CompilerParams(
            dimension_semantics=("parallel", "parallel"),
            vmem_limit_bytes=32 * 1024 * 1024),
        cost_estimate=cost,
    )(x2d, w)


# ----------------------------------------------------------------------------
# forward pass (wrapper)
# ----------------------------------------------------------------------------

def _expand_rope_tables(cos, sin, S, H, D):
    """cos/sin: [S_max, D//2] -> interleave-expanded, per-head tiled [S, H*D] tables.

    cos_e[s, h*D + 2i]   = cos[s, i],  cos_e[s, h*D + 2i+1] = cos[s, i]
    sin_e[s, h*D + 2i]   = -sin[s, i], sin_e[s, h*D + 2i+1] = +sin[s, i]
    """
    c = cos[:S].astype(jnp.float32)                      # (S, D/2)
    s = sin[:S].astype(jnp.float32)
    cos_e = jnp.repeat(c, 2, axis=-1)                    # (S, D)
    sin_e = jnp.stack([-s, s], axis=-1).reshape(S, D)    # (S, D)
    cos_e = jnp.tile(cos_e, (1, H))                      # (S, E)
    sin_e = jnp.tile(sin_e, (1, H))
    return cos_e, sin_e


def flash_attention_forward(params, hidden_states, cos, sin, attention_mask=None):
    # TODO(synk): dropout assumed 0.0 (eval / deterministic); PyTorch's per-chunk
    #             softmax for seq_length > 1024 is replaced by the (equivalent for
    #             seq <= 1024) global online softmax.
    B, S, E = hidden_states.shape
    H = params["n_head"]
    D = E // H
    scale = D ** (-0.5)

    w_qkv = jnp.concatenate([params["wq"], params["wk"], params["wv"]], axis=0)  # (3E, E)
    cos_e, sin_e = _expand_rope_tables(cos, sin, S, H, D)

    # q comes out pre-scaled by 1/sqrt(D).
    q, k, v = qkv_rope_proj(hidden_states, w_qkv, cos_e, sin_e, scale)   # [B,S,E] each

    # Fuse the output projection into the attention kernel when wo comfortably
    # fits in VMEM alongside the q/k/v tiles; otherwise run a tiled linear.
    itemsize = jnp.dtype(hidden_states.dtype).itemsize
    fuse_out_proj = (E * E * itemsize) <= (8 * 1024 * 1024)

    if fuse_out_proj:
        return flash_attention(q, k, v, attention_mask, params["wo"], H=H)
    ctx = flash_attention(q, k, v, attention_mask, None, H=H)            # [B,S,E]
    return linear_nt(ctx.reshape(B * S, E), params["wo"]).reshape(B, S, E)


# ----------------------------------------------------------------------------
# pure-JAX reference (mirrors the PyTorch module)
# ----------------------------------------------------------------------------

def _reference_rotary(xq, xk, cos, sin):
    S = xq.shape[1]
    c = cos[:S][None, :, None, :]
    s = sin[:S][None, :, None, :]

    def rot(x):
        xr = x[..., 0::2]
        xi = x[..., 1::2]
        out_r = xr * c - xi * s
        out_i = xr * s + xi * c
        return jnp.stack([out_r, out_i], axis=-1).reshape(x.shape)

    return rot(xq), rot(xk)


def reference_forward(params, hidden_states, cos, sin, attention_mask=None):
    B, S, E = hidden_states.shape
    H = params["n_head"]
    D = E // H
    scale = D ** (-0.5)

    q = (hidden_states @ params["wq"].T).reshape(B, S, H, D)
    k = (hidden_states @ params["wk"].T).reshape(B, S, H, D)
    v = (hidden_states @ params["wv"].T).reshape(B, S, H, D)
    q, k = _reference_rotary(q, k, cos, sin)
    q = q.transpose(0, 2, 1, 3)
    k = k.transpose(0, 2, 1, 3)
    v = v.transpose(0, 2, 1, 3)
    s = jnp.einsum("bhqd,bhkd->bhqk", q, k) * scale
    if attention_mask is not None:
        s = s + attention_mask
    p = jax.nn.softmax(s.astype(jnp.float32), axis=-1).astype(q.dtype)
    o = jnp.einsum("bhqk,bhkd->bhqd", p, v)
    o = o.transpose(0, 2, 1, 3).reshape(B, S, E)
    return o @ params["wo"].T


# ----------------------------------------------------------------------------
# main
# ----------------------------------------------------------------------------

if __name__ == "__main__":
    # config: n_embd=32, n_head=4 -> head_dim=8; batch=2, seq=8; dropout=0.0
    B, S, E, H = 2, 8, 32, 4
    D = E // H

    key = jax.random.PRNGKey(0)
    kx, kq, kk, kv, ko = jax.random.split(key, 5)

    hidden_states = jax.random.normal(kx, (B, S, E), dtype=jnp.float32)
    params = {
        "n_head": H,
        "wq": 0.02 * jax.random.normal(kq, (E, E), dtype=jnp.float32),
        "wk": 0.02 * jax.random.normal(kk, (E, E), dtype=jnp.float32),
        "wv": 0.02 * jax.random.normal(kv, (E, E), dtype=jnp.float32),
        "wo": 0.02 * jax.random.normal(ko, (E, E), dtype=jnp.float32),
    }

    # precompute rotary frequencies (cos/sin of freqs_cis), theta = 10000
    theta = 10000.0
    freqs = 1.0 / (theta ** (jnp.arange(0, D, 2, dtype=jnp.float32) / D))   # (D/2,)
    t = jnp.arange(S, dtype=jnp.float32)
    angles = jnp.outer(t, freqs)                                            # (S, D/2)
    cos, sin = jnp.cos(angles), jnp.sin(angles)

    # --- unmasked path ---
    out = flash_attention_forward(params, hidden_states, cos, sin)
    out = jax.block_until_ready(out)
    ref = reference_forward(params, hidden_states, cos, sin)
    np.testing.assert_allclose(np.asarray(out), np.asarray(ref), rtol=1e-5, atol=1e-5)

    # --- additive (causal) attention-mask path ---
    causal = jnp.where(jnp.arange(S)[:, None] >= jnp.arange(S)[None, :],
                       0.0, -1e9).astype(jnp.float32)
    mask = jnp.broadcast_to(causal, (B, 1, S, S))
    out_m = flash_attention_forward(params, hidden_states, cos, sin,
                                    attention_mask=mask)
    out_m = jax.block_until_ready(out_m)
    ref_m = reference_forward(params, hidden_states, cos, sin, attention_mask=mask)
    np.testing.assert_allclose(np.asarray(out_m), np.asarray(ref_m),
                               rtol=1e-5, atol=1e-5)

    print("KERNEL_OK")
</pallas_src>

<mosaic_0001>
module attributes {stable_mosaic.version = 11 : i64} {
  func.func @_qkv_rope_kernel(%arg0: i32, %arg1: i32, %arg2: memref<1x8x32xf32, #tpu.memory_space<vmem>>, %arg3: memref<96x32xf32, #tpu.memory_space<vmem>>, %arg4: memref<8x32xf32, #tpu.memory_space<vmem>>, %arg5: memref<8x32xf32, #tpu.memory_space<vmem>>, %arg6: memref<1x8x32xf32, #tpu.memory_space<vmem>>, %arg7: memref<1x8x32xf32, #tpu.memory_space<vmem>>, %arg8: memref<1x8x32xf32, #tpu.memory_space<vmem>>) attributes {dimension_semantics = [#tpu.dimension_semantics<parallel>, #tpu.dimension_semantics<parallel>], iteration_bounds = array<i64: 2, 1>, scalar_prefetch = 0 : i64, scratch_operands = 0 : i64, tpu.core_type = #tpu.core_type<tc>, window_params = [{transform_indices = @transform_0, window_bounds = array<i64: 1, 8, 32>}, {pipeline_mode = #tpu.pipeline_mode<synchronous>, transform_indices = @transform_1, window_bounds = array<i64: 96, 32>}, {transform_indices = @transform_2, window_bounds = array<i64: 8, 32>}, {transform_indices = @transform_3, window_bounds = array<i64: 8, 32>}, {transform_indices = @transform_4, window_bounds = array<i64: 1, 8, 32>}, {transform_indices = @transform_5, window_bounds = array<i64: 1, 8, 32>}, {transform_indices = @transform_6, window_bounds = array<i64: 1, 8, 32>}]} {
    %c0 = arith.constant 0 : index
    %c0_0 = arith.constant 0 : index
    %c0_1 = arith.constant 0 : index
    %0 = vector.load %arg2[%c0, %c0_0, %c0_1] : memref<1x8x32xf32, #tpu.memory_space<vmem>>, vector<1x8x32xf32>
    %1 = vector.shape_cast %0 : vector<1x8x32xf32> to vector<8x32xf32>
    %c0_2 = arith.constant 0 : index
    %c0_3 = arith.constant 0 : index
    %2 = vector.load %arg3[%c0_2, %c0_3] : memref<96x32xf32, #tpu.memory_space<vmem>>, vector<96x32xf32>
    %cst = arith.constant dense<0.000000e+00> : vector<8x96xf32>
    %3 = tpu.matmul %1, %2, %cst {dimension_numbers = #tpu.dot_dimension_numbers<[1], [1], [0], [0], [0, 0, 1, 0], [], []>} : vector<8x32xf32>, vector<96x32xf32>, vector<8x96xf32> -> vector<8x96xf32>
    %4 = vector.extract_strided_slice %3 {offsets = [0, 0], sizes = [8, 32], strides = [1, 1]} : vector<8x96xf32> to vector<8x32xf32>
    %5 = vector.extract_strided_slice %3 {offsets = [0, 32], sizes = [8, 32], strides = [1, 1]} : vector<8x96xf32> to vector<8x32xf32>
    %6 = vector.extract_strided_slice %3 {offsets = [0, 64], sizes = [8, 32], strides = [1, 1]} : vector<8x96xf32> to vector<8x32xf32>
    %c0_4 = arith.constant 0 : index
    %c0_5 = arith.constant 0 : index
    %7 = vector.load %arg4[%c0_4, %c0_5] : memref<8x32xf32, #tpu.memory_space<vmem>>, vector<8x32xf32>
    %c0_6 = arith.constant 0 : index
    %c0_7 = arith.constant 0 : index
    %8 = vector.load %arg5[%c0_6, %c0_7] : memref<8x32xf32, #tpu.memory_space<vmem>>, vector<8x32xf32>
    %9 = tpu.iota {dimensions = array<i32: 1>} : vector<8x32xi32>
    %c1_i32 = arith.constant 1 : i32
    %10 = vector.broadcast %c1_i32 : i32 to vector<8x32xi32>
    %11 = arith.andi %9, %10 : vector<8x32xi32>
    %c0_i32 = arith.constant 0 : i32
    %12 = vector.broadcast %c0_i32 : i32 to vector<8x32xi32>
    %13 = arith.cmpi eq, %11, %12 : vector<8x32xi32>
    %14 = vector.extract_strided_slice %4 {offsets = [0, 1], sizes = [8, 31], strides = [1, 1]} : vector<8x32xf32> to vector<8x31xf32>
    %15 = vector.extract_strided_slice %4 {offsets = [0, 0], sizes = [8, 1], strides = [1, 1]} : vector<8x32xf32> to vector<8x1xf32>
    %16 = tpu.concatenate %14, %15 in 1 : vector<8x31xf32>, vector<8x1xf32> -> vector<8x32xf32>
    %17 = vector.extract_strided_slice %4 {offsets = [0, 31], sizes = [8, 1], strides = [1, 1]} : vector<8x32xf32> to vector<8x1xf32>
    %18 = vector.extract_strided_slice %4 {offsets = [0, 0], sizes = [8, 31], strides = [1, 1]} : vector<8x32xf32> to vector<8x31xf32>
    %19 = tpu.concatenate %17, %18 in 1 : vector<8x1xf32>, vector<8x31xf32> -> vector<8x32xf32>
    %20 = arith.select %13, %16, %19 : vector<8x32xi1>, vector<8x32xf32>
    %21 = arith.mulf %4, %7 : vector<8x32xf32>
    %22 = arith.mulf %20, %8 : vector<8x32xf32>
    %23 = arith.addf %21, %22 : vector<8x32xf32>
    %cst_8 = arith.constant 0.353553385 : f32
    %24 = vector.broadcast %cst_8 : f32 to vector<8x32xf32>
    %25 = arith.mulf %23, %24 : vector<8x32xf32>
    %c0_9 = arith.constant 0 : index
    %c0_10 = arith.constant 0 : index
    %c0_11 = arith.constant 0 : index
    %26 = vector.load %arg6[%c0_9, %c0_10, %c0_11] : memref<1x8x32xf32, #tpu.memory_space<vmem>>, vector<1x8x32xf32>
    %27 = vector.shape_cast %26 : vector<1x8x32xf32> to vector<8x32xf32>
    %28 = vector.shape_cast %25 : vector<8x32xf32> to vector<1x8x32xf32>
    tpu.vector_store %arg6[%c0_9, %c0_10, %c0_11], %28 {strides = array<i32>} : memref<1x8x32xf32, #tpu.memory_space<vmem>>, vector<1x8x32xf32>,
    %29 = vector.extract_strided_slice %5 {offsets = [0, 1], sizes = [8, 31], strides = [1, 1]} : vector<8x32xf32> to vector<8x31xf32>
    %30 = vector.extract_strided_slice %5 {offsets = [0, 0], sizes = [8, 1], strides = [1, 1]} : vector<8x32xf32> to vector<8x1xf32>
    %31 = tpu.concatenate %29, %30 in 1 : vector<8x31xf32>, vector<8x1xf32> -> vector<8x32xf32>
    %32 = vector.extract_strided_slice %5 {offsets = [0, 31], sizes = [8, 1], strides = [1, 1]} : vector<8x32xf32> to vector<8x1xf32>
    %33 = vector.extract_strided_slice %5 {offsets = [0, 0], sizes = [8, 31], strides = [1, 1]} : vector<8x32xf32> to vector<8x31xf32>
    %34 = tpu.concatenate %32, %33 in 1 : vector<8x1xf32>, vector<8x31xf32> -> vector<8x32xf32>
    %35 = arith.select %13, %31, %34 : vector<8x32xi1>, vector<8x32xf32>
    %36 = arith.mulf %5, %7 : vector<8x32xf32>
    %37 = arith.mulf %35, %8 : vector<8x32xf32>
    %38 = arith.addf %36, %37 : vector<8x32xf32>
    %c0_12 = arith.constant 0 : index
    %c0_13 = arith.constant 0 : index
    %c0_14 = arith.constant 0 : index
    %39 = vector.load %arg7[%c0_12, %c0_13, %c0_14] : memref<1x8x32xf32, #tpu.memory_space<vmem>>, vector<1x8x32xf32>
    %40 = vector.shape_cast %39 : vector<1x8x32xf32> to vector<8x32xf32>
    %41 = vector.shape_cast %38 : vector<8x32xf32> to vector<1x8x32xf32>
    tpu.vector_store %arg7[%c0_12, %c0_13, %c0_14], %41 {strides = array<i32>} : memref<1x8x32xf32, #tpu.memory_space<vmem>>, vector<1x8x32xf32>,
    %c0_15 = arith.constant 0 : index
    %c0_16 = arith.constant 0 : index
    %c0_17 = arith.constant 0 : index
    %42 = vector.load %arg8[%c0_15, %c0_16, %c0_17] : memref<1x8x32xf32, #tpu.memory_space<vmem>>, vector<1x8x32xf32>
    %43 = vector.shape_cast %42 : vector<1x8x32xf32> to vector<8x32xf32>
    %44 = vector.shape_cast %6 : vector<8x32xf32> to vector<1x8x32xf32>
    tpu.vector_store %arg8[%c0_15, %c0_16, %c0_17], %44 {strides = array<i32>} : memref<1x8x32xf32, #tpu.memory_space<vmem>>, vector<1x8x32xf32>,
    return
  }
  func.func @transform_0(%arg0: i32, %arg1: i32) -> (i32, i32, i32) {
    %c0_i32 = arith.constant 0 : i32
    %c0_i32_0 = arith.constant 0 : i32
    return %arg0, %arg1, %c0_i32 : i32, i32, i32
  }
  func.func @transform_1(%arg0: i32, %arg1: i32) -> (i32, i32) {
    %c0_i32 = arith.constant 0 : i32
    %c0_i32_0 = arith.constant 0 : i32
    %c0_i32_1 = arith.constant 0 : i32
    return %c0_i32, %c0_i32_0 : i32, i32
  }
  func.func @transform_2(%arg0: i32, %arg1: i32) -> (i32, i32) {
    %c0_i32 = arith.constant 0 : i32
    %c0_i32_0 = arith.constant 0 : i32
    return %arg1, %c0_i32 : i32, i32
  }
  func.func @transform_3(%arg0: i32, %arg1: i32) -> (i32, i32) {
    %c0_i32 = arith.constant 0 : i32
    %c0_i32_0 = arith.constant 0 : i32
    return %arg1, %c0_i32 : i32, i32
  }
  func.func @transform_4(%arg0: i32, %arg1: i32) -> (i32, i32, i32) {
    %c0_i32 = arith.constant 0 : i32
    %c0_i32_0 = arith.constant 0 : i32
    return %arg0, %arg1, %c0_i32 : i32, i32, i32
  }
  func.func @transform_5(%arg0: i32, %arg1: i32) -> (i32, i32, i32) {
    %c0_i32 = arith.constant 0 : i32
    %c0_i32_0 = arith.constant 0 : i32
    return %arg0, %arg1, %c0_i32 : i32, i32, i32
  }
  func.func @transform_6(%arg0: i32, %arg1: i32) -> (i32, i32, i32) {
    %c0_i32 = arith.constant 0 : i32
    %c0_i32_0 = arith.constant 0 : i32
    return %arg0, %arg1, %c0_i32 : i32, i32, i32
  }
}

</mosaic_0001>

<bundles_post_ra>
// kernel: tpu_custom_call.1
= control target key start
LH: loop header
LB: loop body
LE: loop exit
PB: predicated region body
PF: predicated region fallthrough
CT: control target
= control target key end

     0   :  { %s1211_s0 = inlined_call_operand.vmem [shape: f32[2,8,32], index: 0, kind: input, shape index: {}]   ;;  %s1212_s1 = inlined_call_operand.vmem [shape: f32[96,32], index: 1, kind: input, shape index: {}]   ;;  %s1213_s2 = inlined_call_operand.vmem [shape: f32[8,32], index: 2, kind: input, shape index: {}]   ;;  %s1214_s3 = inlined_call_operand.vmem [shape: f32[8,32], index: 3, kind: input, shape index: {}]   ;;  %s1215_s4 = inlined_call_operand.hbm [shape: f32[2,8,32], index: 4, kind: output, shape index: {0}]   ;;  %s1216_s5 = inlined_call_operand.hbm [shape: f32[2,8,32], index: 5, kind: output, shape index: {1}]   ;;  %s1217_s6 = inlined_call_operand.hbm [shape: f32[2,8,32], index: 6, kind: output, shape index: {2}]  }
   0x1   :  { %1221 = sst [smem:[#allocation9_spill]] %s1211_s0 }
   0x2   :  { %1222 = sst [smem:[#allocation10_spill]] %s1212_s1 }
   0x3   :  { %12 = vsyncpa [#allocation3], 0 }
   0x4   :  { %14 = vsyncpa [#allocation3 + $0x1], 0 }
   0x5   :  { %15 = vsyncpa [#allocation5], 0 }
   0x6   :  { %17 = vsyncpa [#allocation5 + $0x1], 0  ;;  %s972_s21 = smov 0   ;;  %s974_s22 = smov 0  }
   0x7   :  { %s976_s23 = smov 0   ;;  %s978_s24 = smov 0  }
   0x8   :  { %s980_s25 = smov 0   ;;  %s982_s26 = smov 0  }
   0x9 LB: > { %s1220_s27 = sadd.s32 4294967295, %s926_s26   ;;  %s1218_s28 = sadd.s32 4294967294, %s926_s26   ;;  %s926_s26 = sphi %s982_s26, %s23_s26   ;;  %s922_s25 = sphi %s980_s25, %s1236_s25   ;;  %s918_s24 = sphi %s978_s24, %s1235_s24   ;;  %s914_s23 = sphi %s976_s23, %s1234_s23   ;;  %s910_s22 = sphi %s974_s22, %s1233_s22   ;;  %s906_s21 = sphi %s972_s21, %s1232_s21  }
   0xa   : > { %s35_s29 = sadd.s32 1, %s922_s25  ;;  %s145_s30 = sadd.s32 1, %s914_s23 }
   0xb   : > { %p37_p0 = scmp.ge.s32.totalorder %s35_s29, 2  ;;  %p155_p1 = scmp.ne.s32.totalorder %s914_s23, %s910_s22 }
   0xc   : > { %p156_p2 = scmp.eq.s32.totalorder %s1220_s27, 1  ;;  %p161_p3 = scmp.ne.s32.totalorder %s910_s22, %s906_s21 }
   0xd   : > { %s1238_s29 = smov (%p37_p0, %s35_s29), 0  ;;  %p162_p5 = scmp.eq.s32.totalorder %s1218_s28, 1 }
   0xe   : > { %p1014_p4 = por %p156_p2, %p155_p1  ;;  %s140_s8 = ssub.s32 %s922_s25, %s1238_s29 }
   0xf   : > { %p688_p6 = scmp.ge.s32.totalorder %s926_s26, 1  ;;  %p143_p7 = scmp.eq.s32.totalorder %s140_s8, 0 }
  0x10   : > { %p1023_p8 = por %p162_p5, %p161_p3  ;;  %p263_p9 = scmp.lt.s32.totalorder %s926_s26, 3 }
  0x11   : > { %s1029_s10 = scalar_select %p143_p7, %s914_s23, %s145_s30  }
  0x12   : > { %p264_p10 = pnand %p688_p6, %p263_p9 }
  0x13   : > { %s1225_s1 = sld [smem:[#allocation10_spill]] (!%p264_p10)  ;;  %s928_s11 = smov (!%p264_p10), 32  }
  0x14   : > { %267 = sbr.rel (%p264_p10) target bundleno = 525 (0x20d), region = 36  ;;  %p313_p11 = scmp.lt.s32.totalorder (!%p264_p10), %s918_s24, 1 }
  0x15   : > { %s1226_s0 = sld [smem:[#allocation9_spill]] (!%p264_p10)  ;;  %s929_s20 = smov (!%p264_p10), 95  }
  0x16   : > { %s930_s30 = smov (!%p264_p10), 127   ;;  %s932_s12 = smov (!%p264_p10), 97  }
  0x17   : > { %s933_s13 = smov (!%p264_p10), 1   ;;  %s935_s15 = smov (!%p264_p10), 64  }
  0x18   : > { %s296_s18 = sand.u32 (!%p264_p10), 1, %s910_s22   ;;  %s808_s27 = scalar_lea.hbm (!%p264_p10), %s1215_s4, 16 }
  0x19   : > { %v340_v0 = vld [vmem:[%s1225_s1 + $0x58] sm:$0xff]  ;;  %vm341_vm0 = vcmask 261120   ;;  %v339_v1 = vld [vmem:[%s1225_s1 + $0x50] sm:$0xff]  ;;  %v338_v2 = vld [vmem:[%s1225_s1 + $0x48] sm:$0xff]  ;;  %s314_s8 = scalar_select %p313_p11, %s918_s24, 1  ;;  %v403_v15 = vlaneseq  ;;  %vm414_vm1 = vcmask 252928  }
  0x1a   : > { %693 = vmatpush.xpose.msk.msra.mxu0 %vm341_vm0, %v340_v0  ;;  %v337_v3 = vld [vmem:[%s1225_s1 + $0x40] sm:$0xff]  ;;  %v336_v4 = vld [vmem:[%s1225_s1 + $0x38] sm:$0xff]  ;;  %v335_v6 = vld [vmem:[%s1225_s1 + $0x30] sm:$0xff]  ;;  %vm422_vm2 = vcmask 7168   ;;  %s460_s16 = scalar_lea.sflag [#allocation3], %s296_s18 }
  0x1b   : > { %v401_v5 = vld [vmem:[%s1213_s2] sm:$0xff]  ;;  %v334_v7 = vld [vmem:[%s1225_s1 + $0x28] sm:$0xff]  ;;  %v332_v9 = vld [vmem:[%s1225_s1 + $0x18] sm:$0xff]  ;;  %s692_s14 = sshll.u32 %s314_s8, 3  ;;  %s931_s8 = smov 65   ;;  %v404_v16 = vand.u32 127, %v403_v15 }
  0x1c   : > { %440 = vrot.lane.b32.xlu2 %v401_v5, %s928_s11  ;;  %v333_v8 = vld [vmem:[%s1225_s1 + $0x20] sm:$0xff]  ;;  %v331_v10 = vld [vmem:[%s1225_s1 + $0x10] sm:$0xff]  ;;  %v330_v11 = vld [vmem:[%s1225_s1 + $0x8] sm:$0xff]  ;;  %s319_s19 = scalar_lea.vmem %s1226_s0, %s692_s14  ;;  %s934_s14 = smov 31  }
  0x1d   : > { %v329_v12 = vld [vmem:[%s1225_s1] sm:$0xff]  ;;  %v405_v19 = vand.u32 1, %v404_v16 }
  0x1e   : > { %694 = vmatpush.xpose.msk.msra.mxu0 %vm341_vm0, %v339_v1  ;;  %v328_v13 = vld [vmem:[%s319_s19] sm:$0xff]  ;;  %s1112_s19 = sshll.u32 %s296_s18, 3 }
  0x1f   : > { %vm1098_vm3 = vcmp.eq.s32.totalorder %v405_v19, 0  ;;  %v402_v23 = vld [vmem:[%s1214_s3] sm:$0xff] }
  0x22   : > { %695 = vmatpush.xpose.msk.msra.mxu0 %vm341_vm0, %v338_v2 }
  0x26   : > { %696 = vmatpush.xpose.msk.msra.mxu0 %vm341_vm0, %v337_v3 }
  0x2a   : > { %697 = vmatpush.xpose.msk.msra.mxu0 %vm341_vm0, %v336_v4 }
  0x2e   : > { %698 = vmatpush.xpose.msk.msra.mxu0 %vm341_vm0, %v335_v6 }
  0x32   : > { %699 = vmatpush.xpose.msk.msra.mxu0 %vm341_vm0, %v334_v7 }
  0x36   : > { %700 = vmatpush.xpose.msk.msra.mxu0 %vm341_vm0, %v333_v8 }
  0x3a   : > { %701 = vmatpush.xpose.msk.msra.mxu0 %vm341_vm0, %v332_v9 }
  0x3e   : > { %702 = vmatpush.xpose.msk.msra.mxu0 %vm341_vm0, %v331_v10 }
  0x42   : > { %703 = vmatpush.xpose.msk.msra.mxu0 %vm341_vm0, %v330_v11 }
  0x46   : > { %704 = vmatpush.xpose.msk.msra.mxu0 %vm341_vm0, %v329_v12 }
  0x49   : > { %705 = vmatmul.msk.f32.vlgmr.msra.gmra.mxu0 %vm341_vm0, %v328_v13 }
  0xc6   : > { %v1089_v14 = vpop.f32.mrf.mxu0 }
  0xc7   : > { %430 = vrot.lane.b32.xlu1 %v1089_v14, %s929_s20  ;;  %408 = vrot.lane.b32.xlu0 %v1089_v14, %s930_s30  ;;  %v425_v33 = vmul.f32 %v401_v5, %v1089_v14  ;;  %s298_s20 = scalar_lea.vmem [#allocation2], %s1112_s19  ;;  %s1121_s30 = sshll.u32 %s918_s24, 3 }
  0xcf   : > { %434 = vrot.lane.b32.xlu1 %v1089_v14, %s931_s8  ;;  %416 = vrot.lane.b32.xlu0 %v1089_v14, %s932_s12 }
  0xd7   : > { %419 = vrot.lane.b32.xlu1 %v1089_v14, %s933_s13  ;;  %411 = vrot.lane.b32.xlu0 %v1089_v14, %s934_s14  ;;  %s481_s13 = scalar_lea.hbm %s1215_s4, %s1121_s30  ;;  %s483_s14 = sshll.u32 %s298_s20, 4  ;;  %s484_s14 = int_to_ptr.vmem [resolvable:$true] %s483_s14 }
  0xdf   : > { %455 = vrot.lane.b32.xlu0 %v1089_v14, %s935_s15  ;;  %s485_s15 = sshll.u32 %s481_s13, 4  ;;  %s486_s15 = int_to_ptr.hbm [resolvable:$true] %s485_s15 }
  0xe0   : > { %s802_s17 = sshra.s32 %s486_s15, 4  ;;  %s803_s17 = int_to_ptr.hbm [resolvable:$true] %s802_s17 }
  0xe1   : > { %s804_s28 = scalar_lea.hbm %s803_s17, 8  ;;  %p809_p1 = scmp.lt.s32.totalorder %s803_s17, %s1215_s4 }
  0xe2   : > { %p805_p12 = scmp.ne.s32.totalorder %s803_s17, %s804_s28  ;;  %p810_p2 = scmp.lt.s32.totalorder %s808_s27, %s804_s28 }
  0xe4   : > { %p806_p13 = pnand %p805_p12, %p1014_p4  ;;  %p811_p3 = por %p810_p2, %p809_p1 }
  0xe6   : > { %p807_p0 = pneg %p806_p13 }
  0xe8   : > { %p812_p5 = pnand %p811_p3, %p807_p0 }
 0x139   : > { %v431_v17 = vpop.permute.xlu1 %430  ;;  %v409_v18 = vpop.permute.xlu0 %408 }
 0x13a   : > { %v433_v24 = vsel %vm414_vm1, %v431_v17, %v409_v18 }
 0x141   : > { %v435_v21 = vpop.permute.xlu1 %434  ;;  %v417_v22 = vpop.permute.xlu0 %416 }
 0x142   : > { %v437_v25 = vsel %vm422_vm2, %v435_v21, %v417_v22 }
 0x143   : > { %v438_v26 = vsel %vm1098_vm3, %v433_v24, %v437_v25 }
 0x144   : > { %v444_v27 = vmul.f32 %v438_v26, %v402_v23 }
 0x146   : > { %446 = vrot.lane.b32.xlu2 %v444_v27, %s928_s11  ;;  %s1219_s11 = scalar_lea.vmem [#allocation6], %s1112_s19 }
 0x149   : > { %v420_v28 = vpop.permute.xlu1 %419  ;;  %v412_v29 = vpop.permute.xlu0 %411 }
 0x14a   : > { %v423_v30 = vsel %vm422_vm2, %v417_v22, %v420_v28  ;;  %v415_v31 = vsel %vm414_vm1, %v409_v18, %v412_v29 }
 0x14b   : > { %v424_v32 = vsel %vm1098_vm3, %v415_v31, %v423_v30 }
 0x14c   : > { %v426_v34 = vmul.f32 %v424_v32, %v402_v23 }
 0x14e   : > { %v427_v35 = vadd.f32 %v426_v34, %v425_v33 }
 0x150   : > { %v428_v36 = vmul.f32 0.35355338, %v427_v35 }
 0x151   : > { %v456_v37 = vpop.permute.xlu0 %455 }
 0x152   : > { %458 = vst.msk [vmem:[%s1219_s11] sm:$0xff] %vm341_vm0, %v456_v37 }
 0x153   : > { %429 = vst.msk [vmem:[%s298_s20] sm:$0xff] %vm341_vm0, %v428_v36 }
 0x154   : > { %815 = shalt.err (!%p812_p5)
}
 0x155   : > { %714 = dma.vmem_to_hbm [thread:$0]  (%p1014_p4), %s484_s14, 128, %s486_s15, %s460_s16   ;;  %v441_v38 = vpop.permute.xlu2 %440 }
 0x156   : > { %v443_v39 = vmul.f32 %v441_v38, %v1089_v14  ;;  %s936_s18 = smov 96   ;;  %s496_s27 = scalar_lea.hbm %s1216_s5, %s1121_s30 }
 0x157   : > { %s511_s20 = scalar_lea.hbm %s1217_s6, %s1121_s30  ;;  %s1229_s8 = sadd.s32 4294967295, %s926_s26  }
 0x158   : > { %s1148_s12 = sand.u32 1, %s1229_s8   ;;  %s305_s13 = scalar_lea.vmem [#allocation4], %s1112_s19 }
 0x159   : > { %s498_s14 = sshll.u32 %s305_s13, 4  ;;  %s500_s15 = sshll.u32 %s496_s27, 4  ;;  %s499_s14 = int_to_ptr.vmem [resolvable:$true] %s498_s14  ;;  %s501_s15 = int_to_ptr.hbm [resolvable:$true] %s500_s15 }
 0x15a   : > { %s1230_s16 = scalar_lea.vmem [#allocation6], %s1112_s19  ;;  %s1155_s24 = sshll.u32 %s511_s20, 4  ;;  %s516_s24 = int_to_ptr.hbm [resolvable:$true] %s1155_s24 }
 0x15b   : > { %s1153_s17 = sshll.u32 %s1230_s16, 4  ;;  %s465_s30 = scalar_lea.sflag [#allocation5], %s1148_s12  ;;  %s514_s17 = int_to_ptr.vmem [resolvable:$true] %s1153_s17 }
 0x15c   : > { %s836_s27 = scalar_lea.hbm %s1216_s5, 16 }
 0x1a0   : > { %v447_v40 = vpop.permute.xlu2 %446 }
 0x1a1   : > { %v449_v41 = vadd.f32 %v447_v40, %v443_v39 }
 0x1a3   : > { %451 = vrot.lane.b32.xlu2 %v449_v41, %s936_s18  ;;  %s830_s18 = sshra.s32 %s501_s15, 4  ;;  %s831_s18 = int_to_ptr.hbm [resolvable:$true] %s830_s18 }
 0x1a4   : > { %s832_s0 = scalar_lea.hbm %s831_s18, 8  ;;  %p837_p10 = scmp.lt.s32.totalorder %s831_s18, %s1216_s5 }
 0x1a5   : > { %p833_p6 = scmp.ne.s32.totalorder %s831_s18, %s832_s0  ;;  %p838_p11 = scmp.lt.s32.totalorder %s836_s27, %s832_s0 }
 0x1a7   : > { %p834_p7 = pnand %p833_p6, %p1014_p4  ;;  %p839_p12 = por %p838_p11, %p837_p10 }
 0x1a9   : > { %p835_p9 = pneg %p834_p7 }
 0x1ab   : > { %p840_p13 = pnand %p839_p12, %p835_p9 }
 0x1fd   : > { %v452_v42 = vpop.permute.xlu2 %451 }
 0x1fe   : > { %454 = vst.msk [vmem:[%s305_s13] sm:$0xff] %vm341_vm0, %v452_v42 }
 0x1ff   : > { %843 = shalt.err (!%p840_p13)
}
 0x200   : > { %715 = dma.vmem_to_hbm [thread:$0]  (%p1014_p4), %s499_s14, 128, %s501_s15, %s465_s30  }
 0x201   : > { %s858_s20 = sshra.s32 %s516_s24, 4  ;;  %s864_s16 = scalar_lea.hbm %s1217_s6, 16  ;;  %s859_s20 = int_to_ptr.hbm [resolvable:$true] %s858_s20 }
 0x202   : > { %s860_s8 = scalar_lea.hbm %s859_s20, 8  ;;  %p865_p3 = scmp.lt.s32.totalorder %s859_s20, %s1217_s6 }
 0x203   : > { %p861_p0 = scmp.ne.s32.totalorder %s859_s20, %s860_s8  ;;  %p866_p5 = scmp.lt.s32.totalorder %s864_s16, %s860_s8 }
 0x205   : > { %p862_p1 = pnand %p861_p0, %p1014_p4  ;;  %p867_p6 = por %p866_p5, %p865_p3 }
 0x207   : > { %p863_p2 = pneg %p862_p1 }
 0x209   : > { %p868_p7 = pnand %p867_p6, %p863_p2 }
 0x20b   : > { %871 = shalt.err (!%p868_p7)
}
 0x20c   : > { %716 = dma.vmem_to_hbm [thread:$0]  (%p1014_p4), %s514_s17, 128, %s516_s24, %s465_s30  }
 0x20d PF: > { %p730_p9 = scmp.ge.s32.totalorder %s926_s26, 2  ;;  %s527_s14 = sand.u32 1, %s906_s21  }
 0x20e   : > { %s528_s15 = scalar_lea.sflag [#allocation3], %s527_s14 }
 0x20f   : > { %p721_p10 = pnand %p730_p9, %p1023_p8 }
 0x211   : > { %p722_p11 = pneg %p721_p10 }
 0x213   : > { %897 = dma.done.wait (%p722_p11), %s528_s15, 128  }
 0x214   : > { %899 = vsyncadd (%p722_p11), %s528_s15, 4294967168  ;;  %s1231_s19 = sadd.s32 4294967294, %s926_s26  }
 0x215   : > { %s537_s7 = sand.u32 1, %s1231_s19  }
 0x216   : > { %s538_s1 = scalar_lea.sflag [#allocation5], %s537_s7 }
 0x217   : > { %901 = dma.done.wait (%p722_p11), %s538_s1, 256  }
 0x218   : > { %903 = vsyncadd (%p722_p11), %s538_s1, 4294967040  ;;  %s23_s26 = sadd.s32 1, %s926_s26   ;;  %s1232_s21 = smov %s910_s22 }
 0x219   : > { %p20_p4 = scmp.ge.s32.totalorder %s23_s26, 4   ;;  %s1233_s22 = smov %s914_s23 }
 0x21a   : > { %s1234_s23 = smov %s1029_s10  ;;  %s1235_s24 = smov %s922_s25 }
 0x21b   : > { %s1236_s25 = smov %s1238_s29  ;;  %22 = sbr.rel (!%p20_p4) target bundleno = 9 (0x9), region = 109 }
 0x220   :  { %554 = vsyncpa [#allocation3], 1 }
 0x221   :  { %556 = vsyncpa [#allocation3 + $0x1], 1 }
 0x222   :  { %557 = vsyncpa [#allocation5], 1 }
 0x223   :  { %559 = vsyncpa [#allocation5 + $0x1], 1 }

</bundles_post_ra>
